<compile_context>
chip_gen: v6e
topology: v6e:2x2x1
jax: 0.10.0
libtpu: 0.0.40
codegen_flags: <defaults>
</compile_context>

<pallas_src>
import functools

import jax
import jax.numpy as jnp
from jax.experimental import pallas as pl
from jax.experimental.pallas import tpu as pltpu

IGNORE_INDEX = -100


def _ppl_tile_kernel(x_ref, t_ref, nll_ref, cnt_ref, *, ignore_index, n_rows):
    """One grid step = one row tile.  Writes independent per-tile partials."""
    i = pl.program_id(0)
    tn = x_ref.shape[0]

    x = x_ref[...].astype(jnp.float32)                              # (TN, C)
    t = t_ref[...]                                                  # (TN, 1) int32

    # Mask rows past the end of the array (last, partial tile) and ignored rows.
    row = i * tn + jax.lax.broadcasted_iota(jnp.int32, (tn, 1), 0)  # (TN, 1)
    valid = jnp.logical_and(t != ignore_index, row < n_rows)        # (TN, 1)

    # Select the target log-prob per row via compare+select (no one-hot mul).
    col = jax.lax.broadcasted_iota(jnp.int32, x.shape, 1)           # (TN, C)
    hit = jnp.logical_and(col == t, valid)                          # (TN, C)

    # Per-lane partial sums of -log p[target]; only a sublane reduce per tile.
    nll_ref[...] = jnp.sum(jnp.where(hit, -x, 0.0), axis=0)[None, None, :]
    cnt_ref[...] = jnp.broadcast_to(jnp.sum(valid.astype(jnp.float32)), (1, 1, 1))


def _auto_tile_n(n_rows, n_cols, itemsize, target_bytes=4 << 20, max_rows=2048):
    """Largest row tile (multiple of 8) with ~target_bytes per input buffer."""
    rows = target_bytes // max(1, n_cols * itemsize)
    rows = max(8, min(max_rows, int(rows)))
    rows = max(8, (rows // 8) * 8)
    n_ceil8 = ((n_rows + 7) // 8) * 8
    return min(rows, n_ceil8)


def perplexity(log_probs: jax.Array, target: jax.Array,
               ignore_index: int = IGNORE_INDEX, tile_n: int | None = None) -> jax.Array:
    """log_probs: (N, C) float log-probabilities; target: (N,) int class ids."""
    N, C = log_probs.shape
    if tile_n is None:
        tile_n = _auto_tile_n(N, C, jnp.dtype(log_probs.dtype).itemsize)
    assert tile_n >= 8 and tile_n % 8 == 0, "tile_n must be a positive multiple of 8"
    grid = -(-N // tile_n)                        # ceil-div; remainder masked in-kernel
    t2d = target.astype(jnp.int32).reshape(N, 1)

    kernel = functools.partial(_ppl_tile_kernel, ignore_index=ignore_index, n_rows=N)

    nll_parts, cnt_parts = pl.pallas_call(
        kernel,
        out_shape=(
            jax.ShapeDtypeStruct((grid, 1, C), jnp.float32),  # per-tile lane-wise NLL sums
            jax.ShapeDtypeStruct((grid, 1, 1), jnp.float32),  # per-tile valid-row counts
        ),
        grid_spec=pltpu.PrefetchScalarGridSpec(
            num_scalar_prefetch=0,
            grid=(grid,),
            in_specs=[
                pl.BlockSpec((tile_n, C), lambda i: (i, 0)),
                pl.BlockSpec((tile_n, 1), lambda i: (i, 0)),
            ],
            out_specs=[
                pl.BlockSpec((1, 1, C), lambda i: (i, 0, 0)),
                pl.BlockSpec((1, 1, 1), lambda i: (i, 0, 0)),
            ],
        ),
        compiler_params=pltpu.CompilerParams(
            # No cross-iteration state -> row axis can shard across v7x's 2 TCs.
            dimension_semantics=("parallel",),
            # ~2 x 4 MiB double-buffered input + small outputs: fits all gens
            # (v5e/v6e 128 MiB, v7x 64 MiB VMEM) with headroom.
            vmem_limit_bytes=32 * 1024 * 1024,
        ),
    )(log_probs, t2d)

    # Tiny final reduction + exp in JAX (keeps the kernel grid fully parallel).
    # NaN if every target is ignored (0/0), matching PyTorch NLLLoss(mean).
    return jnp.exp(jnp.sum(nll_parts) / jnp.sum(cnt_parts))


def perplexity_ref(log_probs, target, ignore_index=IGNORE_INDEX):
    valid = target != ignore_index
    safe_t = jnp.where(valid, target, 0)
    picked = jnp.take_along_axis(log_probs, safe_t[:, None], axis=1)[:, 0]
    nll = jnp.sum(jnp.where(valid, -picked, 0.0)) / jnp.sum(valid)
    return jnp.exp(nll)


if __name__ == "__main__":
    N, C = 50, 128   # N deliberately not a multiple of 8 to exercise remainder masking
    key = jax.random.PRNGKey(0)
    k_logits, k_tgt, k_mask = jax.random.split(key, 3)

    logits = jax.random.normal(k_logits, (N, C), dtype=jnp.float32)
    log_probs = jax.nn.log_softmax(logits, axis=-1)

    target = jax.random.randint(k_tgt, (N,), 0, C, dtype=jnp.int32)
    ignore_mask = jax.random.uniform(k_mask, (N,)) < 0.25
    target = jnp.where(ignore_mask, IGNORE_INDEX, target)

    ref = perplexity_ref(log_probs, target)

    # Auto-sized tile (single partial tile at this small N).
    ppl_auto = perplexity(log_probs, target)
    # Small explicit tile: multi-tile grid + masked remainder tile path.
    ppl_tiled = perplexity(log_probs, target, tile_n=8)
    jax.block_until_ready((ppl_auto, ppl_tiled))

    assert jnp.allclose(ppl_auto, ref, rtol=1e-5, atol=1e-5), (ppl_auto, ref)
    assert jnp.allclose(ppl_tiled, ref, rtol=1e-5, atol=1e-5), (ppl_tiled, ref)

    print("KERNEL_OK")
</pallas_src>

<mosaic_0001>
module attributes {stable_mosaic.version = 11 : i64} {
  func.func @_ppl_tile_kernel(%arg0: i32, %arg1: memref<56x128xf32, #tpu.memory_space<vmem>>, %arg2: memref<56x1xi32, #tpu.memory_space<vmem>>, %arg3: memref<1x1x128xf32, #tpu.memory_space<vmem>>, %arg4: memref<1x1x1xf32, #tpu.memory_space<vmem>>) attributes {dimension_semantics = [#tpu.dimension_semantics<parallel>], iteration_bounds = array<i64: 1>, scalar_prefetch = 0 : i64, scratch_operands = 0 : i64, tpu.core_type = #tpu.core_type<tc>, window_params = [{transform_indices = @transform_0, window_bounds = array<i64: 56, 128>}, {transform_indices = @transform_1, window_bounds = array<i64: 56, 1>}, {transform_indices = @transform_2, window_bounds = array<i64: 1, 1, 128>}, {transform_indices = @transform_3, window_bounds = array<i64: 1, 1, 1>}]} {
    %c0 = arith.constant 0 : index
    %c0_0 = arith.constant 0 : index
    %0 = vector.load %arg1[%c0, %c0_0] : memref<56x128xf32, #tpu.memory_space<vmem>>, vector<56x128xf32>
    %c0_1 = arith.constant 0 : index
    %c0_2 = arith.constant 0 : index
    %1 = vector.load %arg2[%c0_1, %c0_2] : memref<56x1xi32, #tpu.memory_space<vmem>>, vector<56x1xi32>
    %c56_i32 = arith.constant 56 : i32
    %2 = arith.muli %arg0, %c56_i32 : i32
    %3 = tpu.iota {dimensions = array<i32: 0>} : vector<56x1xi32>
    %4 = vector.broadcast %2 : i32 to vector<56x1xi32>
    %5 = arith.addi %4, %3 : vector<56x1xi32>
    %c-100_i32 = arith.constant -100 : i32
    %6 = vector.broadcast %c-100_i32 : i32 to vector<56x1xi32>
    %7 = arith.cmpi ne, %1, %6 : vector<56x1xi32>
    %c50_i32 = arith.constant 50 : i32
    %8 = vector.broadcast %c50_i32 : i32 to vector<56x1xi32>
    %9 = arith.cmpi slt, %5, %8 : vector<56x1xi32>
    %10 = arith.andi %7, %9 : vector<56x1xi1>
    %11 = tpu.iota {dimensions = array<i32: 1>} : vector<56x128xi32>
    %12 = vector.broadcast %1 : vector<56x1xi32> to vector<56x128xi32>
    %13 = arith.cmpi eq, %11, %12 : vector<56x128xi32>
    %14 = vector.broadcast %10 : vector<56x1xi1> to vector<56x128xi1>
    %15 = arith.andi %13, %14 : vector<56x128xi1>
    %cst = arith.constant 0.000000e+00 : f32
    %16 = vector.broadcast %cst : f32 to vector<56x128xf32>
    %17 = arith.subf %16, %0 : vector<56x128xf32>
    %cst_3 = arith.constant 0.000000e+00 : f32
    %18 = vector.broadcast %cst_3 : f32 to vector<56x128xf32>
    %19 = arith.select %15, %17, %18 : vector<56x128xi1>, vector<56x128xf32>
    %cst_4 = arith.constant dense<0.000000e+00> : vector<128xf32>
    %20 = vector.multi_reduction <add>, %19, %cst_4 [0] : vector<56x128xf32> to vector<128xf32>
    %21 = vector.shape_cast %20 : vector<128xf32> to vector<1x1x128xf32>
    %c0_5 = arith.constant 0 : index
    %c0_6 = arith.constant 0 : index
    %c0_7 = arith.constant 0 : index
    %22 = vector.load %arg3[%c0_5, %c0_6, %c0_7] : memref<1x1x128xf32, #tpu.memory_space<vmem>>, vector<1x1x128xf32>
    tpu.vector_store %arg3[%c0_5, %c0_6, %c0_7], %21 {strides = array<i32>} : memref<1x1x128xf32, #tpu.memory_space<vmem>>, vector<1x1x128xf32>,
    %23 = arith.extui %10 : vector<56x1xi1> to vector<56x1xi32>
    %24 = arith.sitofp %23 : vector<56x1xi32> to vector<56x1xf32>
    %25 = vector.shape_cast %24 : vector<56x1xf32> to vector<1x56x1xf32>
    %cst_8 = arith.constant dense<0.000000e+00> : vector<1xf32>
    %26 = vector.multi_reduction <add>, %25, %cst_8 [1, 2] : vector<1x56x1xf32> to vector<1xf32>
    %27 = vector.shape_cast %26 : vector<1xf32> to vector<1x1x1xf32>
    %28 = vector.extract %27[0, 0, 0] : f32 from vector<1x1x1xf32>
    %29 = vector.broadcast %28 : f32 to vector<1x1x1xf32>
    %c0_9 = arith.constant 0 : index
    %c0_10 = arith.constant 0 : index
    %c0_11 = arith.constant 0 : index
    %30 = vector.load %arg4[%c0_9, %c0_10, %c0_11] : memref<1x1x1xf32, #tpu.memory_space<vmem>>, vector<1x1x1xf32>
    tpu.vector_store %arg4[%c0_9, %c0_10, %c0_11], %29 {strides = array<i32>} : memref<1x1x1xf32, #tpu.memory_space<vmem>>, vector<1x1x1xf32>,
    return
  }
  func.func @transform_0(%arg0: i32) -> (i32, i32) {
    %c0_i32 = arith.constant 0 : i32
    %c0_i32_0 = arith.constant 0 : i32
    return %arg0, %c0_i32 : i32, i32
  }
  func.func @transform_1(%arg0: i32) -> (i32, i32) {
    %c0_i32 = arith.constant 0 : i32
    %c0_i32_0 = arith.constant 0 : i32
    return %arg0, %c0_i32 : i32, i32
  }
  func.func @transform_2(%arg0: i32) -> (i32, i32, i32) {
    %c0_i32 = arith.constant 0 : i32
    %c0_i32_0 = arith.constant 0 : i32
    %c0_i32_1 = arith.constant 0 : i32
    return %arg0, %c0_i32, %c0_i32_0 : i32, i32, i32
  }
  func.func @transform_3(%arg0: i32) -> (i32, i32, i32) {
    %c0_i32 = arith.constant 0 : i32
    %c0_i32_0 = arith.constant 0 : i32
    %c0_i32_1 = arith.constant 0 : i32
    return %arg0, %c0_i32, %c0_i32_0 : i32, i32, i32
  }
}

</mosaic_0001>

<bundles_post_ra>
// kernel: tpu_custom_call.1
= control target key start
LH: loop header
LB: loop body
LE: loop exit
PB: predicated region body
PF: predicated region fallthrough
CT: control target
= control target key end

     0   :  { %9 = vsyncpa [#allocation3], 0  ;;  %vm173_vm0 = vcmask 7168   ;;  %v30_v3 = vlaneseq  ;;  %v286_v4 = vmov 0   ;;  %v287_v7 = vmov 0.0   ;;  %s391_s0 = inlined_call_operand.vmem [shape: f32[50,128], index: 0, kind: input, shape index: {}]   ;;  %s392_s1 = inlined_call_operand.vmem [shape: s32[50,1], index: 1, kind: input, shape index: {}]   ;;  %s393_s2 = inlined_call_operand.hbm [shape: f32[1,1,128], index: 2, kind: output, shape index: {0}]   ;;  %s394_s3 = inlined_call_operand.hbm [shape: f32[1,1,1], index: 3, kind: output, shape index: {1}]  }
   0x1   :  { %v23_v0 = vld [vmem:[%s392_s1 + $0x8] sm:$0xff]  ;;  %v22_v1 = vld [vmem:[%s392_s1] sm:$0xff]  ;;  %v24_v2 = vld [vmem:[%s392_s1 + $0x10] sm:$0xff]  ;;  %241 = vset.pattern.permute.xlu1 %v286_v4  ;;  %240 = vset.pattern.permute.xlu0 %v286_v4 }
   0x2   :  { %vm47_vm1 = vcmp.ne.s32.totalorder %v23_v0, 4294967196  ;;  %vm46_vm2 = vcmp.ne.s32.totalorder %v22_v1, 4294967196  ;;  %vm48_vm3 = vcmp.ne.s32.totalorder %v24_v2, 4294967196  ;;  %v25_v5 = vld [vmem:[%s392_s1 + $0x18] sm:$0xff]  ;;  %v26_v6 = vld [vmem:[%s392_s1 + $0x20] sm:$0xff]  ;;  %73 = vperm.xlu1 %241, %v23_v0   ;;  %v27_v11 = vld [vmem:[%s392_s1 + $0x28] sm:$0xff] }
   0x3   :  { %v228_v8 = vsel %vm47_vm1, 1.0, %v287_v7  ;;  %v97_v9 = vsel %vm46_vm2, 1, %v286_v4  ;;  %v227_v10 = vsel %vm46_vm2, 1.0, %v287_v7  ;;  %v28_v12 = vld [vmem:[%s392_s1 + $0x30] sm:$0xff]  ;;  %v229_v15 = vsel %vm48_vm3, 1.0, %v287_v7 }
   0x4   :  { %v175_v13 = vsel %vm173_vm0, %v228_v8, 0.0  ;;  %v174_v14 = vsel %vm173_vm0, %v227_v10, 0.0  ;;  %v31_v16 = vshrl.u32 %v30_v3, 7 }
   0x5   :  { %10 = vsyncpa [#allocation5], 0  ;;  %v176_v17 = vadd.f32 %v175_v13, %v174_v14  ;;  %v177_v18 = vsel %vm173_vm0, %v229_v15, 0.0  ;;  %vm49_vm4 = vcmp.ne.s32.totalorder %v25_v5, 4294967196  ;;  %vm50_vm5 = vcmp.ne.s32.totalorder %v26_v6, 4294967196  ;;  %v16_v52 = vld [vmem:[%s391_s0 + $0x8] sm:$0xff] }
   0x6   :  { %v37_v19 = vadd.s32 48, %v31_v16  ;;  %vm51_vm6 = vcmp.ne.s32.totalorder %v27_v11, 4294967196  ;;  %vm52_vm7 = vcmp.ne.s32.totalorder %v28_v12, 4294967196  ;;  %105 = vperm.xlu1 %241, %v97_v9   ;;  %v230_v21 = vsel %vm49_vm4, 1.0, %v287_v7  ;;  %v15_v54 = vld [vmem:[%s391_s0] sm:$0xff]  ;;  %v17_v55 = vld [vmem:[%s391_s0 + $0x10] sm:$0xff] }
   0x7   :  { %v178_v20 = vadd.f32 %v177_v18, %v176_v17  ;;  %v231_v22 = vsel %vm50_vm5, 1.0, %v287_v7  ;;  %v232_v23 = vsel %vm51_vm6, 1.0, %v287_v7  ;;  %v98_v24 = vsel %vm47_vm1, 1, %v286_v4  ;;  %v18_v58 = vld [vmem:[%s391_s0 + $0x18] sm:$0xff]  ;;  %v20_v9 = vld [vmem:[%s391_s0 + $0x28] sm:$0xff]  ;;  %v21_v14 = vld [vmem:[%s391_s0 + $0x30] sm:$0xff] }
   0x8   :  { %vm59_vm8 = vcmp.lt.s32.totalorder %v37_v19, 50  ;;  %v179_v25 = vsel %vm173_vm0, %v230_v21, 0.0  ;;  %v181_v26 = vsel %vm173_vm0, %v231_v22, 0.0  ;;  %v183_v30 = vsel %vm173_vm0, %v232_v23, 0.0 }
   0x9   :  { %vm343_vm9 = vmand %vm52_vm7, %vm59_vm8  ;;  %v180_v28 = vadd.f32 %v179_v25, %v178_v20  ;;  %v99_v35 = vsel %vm48_vm3, 1, %v286_v4  ;;  %v100_v36 = vsel %vm49_vm4, 1, %v286_v4  ;;  %v101_v37 = vsel %vm50_vm5, 1, %v286_v4 }
   0xa   :  { %v233_v29 = vsel %vm343_vm9, 1.0, %v287_v7  ;;  %108 = vperm.xlu1 %241, %v98_v24   ;;  %v102_v38 = vsel %vm51_vm6, 1, %v286_v4  ;;  %v103_v39 = vsel %vm343_vm9, 1, %v286_v4  ;;  %v68_v49 = vand.u32 127, %v30_v3  ;;  %v19_v3 = vld [vmem:[%s391_s0 + $0x20] sm:$0xff]  ;;  %s288_s0 = smov [#allocation2]  }
   0xb   :  { %v182_v31 = vadd.f32 %v181_v26, %v180_v28  ;;  %v185_v32 = vsel %vm173_vm0, %v233_v29, 0.0  ;;  %v140_v57 = vsub.f32 0.0, %v16_v52  ;;  %v139_v59 = vsub.f32 0.0, %v15_v54  ;;  %s205_s12 = sshll.u32 %s288_s0, 4  ;;  %s206_s12 = int_to_ptr.vmem [resolvable:$true] %s205_s12 }
   0xc   :  { %v141_v61 = vsub.f32 0.0, %v17_v55  ;;  %v144_v16 = vsub.f32 0.0, %v20_v9  ;;  %v145_v20 = vsub.f32 0.0, %v21_v14  ;;  %s242_s13 = scalar_lea.vmem %s206_s12, 16  ;;  %s246_s14 = scalar_lea.vmem %s206_s12, 32 }
   0xd   :  { %v184_v33 = vadd.f32 %v183_v30, %v182_v31  ;;  %p243_p0 = scmp.ne.s32.totalorder %s206_s12, %s242_s13  ;;  %p247_p1 = scmp.lt.s32.totalorder %s206_s12, %s206_s12 }
   0xe   :  { %76 = vperm.xlu1 %241, %v24_v2   ;;  %v142_v2 = vsub.f32 0.0, %v18_v58  ;;  %p248_p2 = scmp.lt.s32.totalorder %s246_s14, %s242_s13 }
   0xf   :  { %v186_v34 = vadd.f32 %v185_v32, %v184_v33 }
  0x10   :  { %p249_p3 = por %p248_p2, %p247_p1 }
  0x11   :  { %187 = vadd.xlane.f32.xlu0 %v186_v34 }
  0x12   :  { %111 = vperm.xlu1 %241, %v99_v35   ;;  %p250_p4 = pnand %p249_p3, %p243_p0 }
  0x16   :  { %79 = vperm.xlu1 %241, %v25_v5  }
  0x1a   :  { %114 = vperm.xlu1 %241, %v100_v36  }
  0x1e   :  { %82 = vperm.xlu1 %241, %v26_v6  }
  0x22   :  { %117 = vperm.xlu1 %241, %v101_v37  }
  0x26   :  { %85 = vperm.xlu1 %241, %v27_v11  }
  0x27   :  { %70 = vperm.xlu0 %240, %v22_v1  }
  0x2a   :  { %120 = vperm.xlu1 %241, %v102_v38  }
  0x2b   :  { %123 = vperm.xlu0 %240, %v103_v39  }
  0x2e   :  { %88 = vperm.xlu1 %241, %v28_v12   ;;  %v143_v12 = vsub.f32 0.0, %v19_v3 }
  0x7d   :  { %v74_v40 = vpop.permute.xlu1 %73 }
  0x7e   :  { %vm91_vm10 = vcmp.eq.s32.totalorder %v68_v49, %v74_v40 }
  0x81   :  { %v106_v41 = vpop.permute.xlu1 %105 }
  0x82   :  { %vm125_vm14 = vcmp.eq.s32.totalorder %v106_v41, 1 }
  0x85   :  { %v109_v42 = vpop.permute.xlu1 %108 }
  0x86   :  { %vm126_vm11 = vcmp.eq.s32.totalorder %v109_v42, 1 }
  0x87   :  { %vm133_vm15 = vmand %vm91_vm10, %vm126_vm11 }
  0x88   :  { %v147_v4 = vsel %vm133_vm15, %v140_v57, 0.0 }
  0x89   :  { %v77_v43 = vpop.permute.xlu1 %76 }
  0x8a   :  { %vm92_vm12 = vcmp.eq.s32.totalorder %v68_v49, %v77_v43 }
  0x8d   :  { %v112_v44 = vpop.permute.xlu1 %111 }
  0x8e   :  { %vm127_vm13 = vcmp.eq.s32.totalorder %v112_v44, 1 }
  0x8f   :  { %vm370_vm0 = vmand %vm92_vm12, %vm127_vm13 }
  0x90   :  { %v148_v11 = vsel %vm370_vm0, %v141_v61, 0.0 }
  0x91   :  { %v80_v45 = vpop.permute.xlu1 %79 }
  0x92   :  { %vm93_vm1 = vcmp.eq.s32.totalorder %v68_v49, %v80_v45 }
  0x95   :  { %v115_v46 = vpop.permute.xlu1 %114 }
  0x96   :  { %vm128_vm2 = vcmp.eq.s32.totalorder %v115_v46, 1 }
  0x97   :  { %vm135_vm6 = vmand %vm93_vm1, %vm128_vm2 }
  0x98   :  { %v149_v15 = vsel %vm135_vm6, %v142_v2, 0.0 }
  0x99   :  { %v83_v48 = vpop.permute.xlu1 %82 }
  0x9a   :  { %v188_v47 = vpop.xlane.xlu0 %187  ;;  %vm94_vm7 = vcmp.eq.s32.totalorder %v68_v49, %v83_v48 }
  0x9b   :  { %v189_v50 = vrot.slane %v188_v47, 4 }
  0x9d   :  { %v190_v51 = vadd.f32 %v189_v50, %v188_v47  ;;  %v118_v53 = vpop.permute.xlu1 %117 }
  0x9e   :  { %vm129_vm5 = vcmp.eq.s32.totalorder %v118_v53, 1 }
  0x9f   :  { %v191_v56 = vrot.slane %v190_v51, 2  ;;  %vm136_vm9 = vmand %vm94_vm7, %vm129_vm5 }
  0xa0   :  { %v150_v19 = vsel %vm136_vm9, %v143_v12, 0.0 }
  0xa1   :  { %v192_v60 = vadd.f32 %v191_v56, %v190_v51  ;;  %v86_v63 = vpop.permute.xlu1 %85 }
  0xa2   :  { %v71_v62 = vpop.permute.xlu0 %70  ;;  %vm95_vm10 = vcmp.eq.s32.totalorder %v68_v49, %v86_v63 }
  0xa3   :  { %vm90_vm3 = vcmp.eq.s32.totalorder %v68_v49, %v71_v62  ;;  %v193_v1 = vrot.slane %v192_v60, 1 }
  0xa4   :  { %vm132_vm4 = vmand %vm90_vm3, %vm125_vm14 }
  0xa5   :  { %v146_v5 = vsel %vm132_vm4, %v139_v59, 0.0  ;;  %v194_v6 = vadd.f32 %v193_v1, %v192_v60  ;;  %v121_v8 = vpop.permute.xlu1 %120 }
  0xa6   :  { %v153_v7 = vadd.f32 %v147_v4, %v146_v5  ;;  %v124_v10 = vpop.permute.xlu0 %123  ;;  %vm130_vm8 = vcmp.eq.s32.totalorder %v121_v8, 1 }
  0xa7   :  { %234 = vpush %v194_v6  ;;  %vm131_vm11 = vcmp.eq.s32.totalorder %v124_v10, 1  ;;  %vm137_vm12 = vmand %vm95_vm10, %vm130_vm8 }
  0xa8   :  { %v154_v13 = vadd.f32 %v153_v7, %v148_v11  ;;  %v151_v22 = vsel %vm137_vm12, %v144_v16, 0.0 }
  0xa9   :  { %v89_v18 = vpop.permute.xlu1 %88 }
  0xaa   :  { %v155_v17 = vadd.f32 %v154_v13, %v149_v15  ;;  %vm96_vm13 = vcmp.eq.s32.totalorder %v68_v49, %v89_v18 }
  0xab   :  { %vm138_vm14 = vmand %vm96_vm13, %vm131_vm11 }
  0xac   :  { %v156_v21 = vadd.f32 %v155_v17, %v150_v19  ;;  %v152_v24 = vsel %vm138_vm14, %v145_v20, 0.0 }
  0xae   :  { %v157_v23 = vadd.f32 %v156_v21, %v151_v22 }
  0xb0   :  { %v158_v25 = vadd.f32 %v157_v23, %v152_v24 }
  0xb2   :  { %v159_v26 = vrot.slane %v158_v25, 4 }
  0xb4   :  { %v160_v27 = vadd.f32 %v159_v26, %v158_v25 }
  0xb6   :  { %v161_v28 = vrot.slane %v160_v27, 2 }
  0xb8   :  { %v162_v29 = vadd.f32 %v161_v28, %v160_v27 }
  0xba   :  { %v163_v30 = vrot.slane %v162_v29, 1 }
  0xbc   :  { %v164_v31 = vadd.f32 %v163_v30, %v162_v29 }
  0xbe   :  { %165 = vst [vmem:[#allocation2] sm:$0x1] %v164_v31 }
  0xbf   :  { %253 = shalt.err (!%p250_p4)
}
  0xc0   :  { %208 = dma.vmem_to_hbm [thread:$0]  %s206_s12, 16, %s393_s2, [#allocation3]   ;;  %vm197_vm15 = vcmask 0  }
  0xc1   :  { %s289_s17 = smov [#allocation4]  }
  0xc2   :  { %s215_s18 = sshll.u32 %s289_s17, 4  ;;  %s216_s18 = int_to_ptr.vmem [resolvable:$true] %s215_s18 }
  0xc3   :  { %s262_s20 = scalar_lea.vmem %s216_s18, 16  ;;  %s266_s21 = scalar_lea.vmem %s216_s18, 32 }
  0xc4   :  { %p263_p5 = scmp.ne.s32.totalorder %s216_s18, %s262_s20  ;;  %p267_p6 = scmp.lt.s32.totalorder %s216_s18, %s216_s18 }
  0xc5   :  { %p268_p7 = scmp.lt.s32.totalorder %s266_s21, %s262_s20 }
  0xc7   :  { %p269_p8 = por %p268_p7, %p267_p6 }
  0xc9   :  { %p270_p9 = pnand %p269_p8, %p263_p5 }
  0xd8   :  { %s235_s19 = spop %234 }
  0xd9   :  { %v196_v32 = vstv %s235_s19 }
  0xda   :  { %198 = vst.msk [vmem:[#allocation4] sm:$0x1] %vm197_vm15, %v196_v32 }
  0xdb   :  { %273 = shalt.err (!%p270_p9)
}
  0xdc   :  { %218 = dma.vmem_to_hbm [thread:$0]  %s216_s18, 16, %s394_s3, [#allocation5]  }
  0xdd   :  { %282 = dma.done.wait [#allocation3], 16  }
  0xde   :  { %283 = vsyncadd [#allocation3], 4294967280 }
  0xdf   :  { %284 = dma.done.wait [#allocation5], 16  }
  0xe0   :  { %285 = vsyncadd [#allocation5], 4294967280 }
  0xe1   :  { %225 = vsyncpa [#allocation3], 1 }
  0xe2   :  { %226 = vsyncpa [#allocation5], 1 }

</bundles_post_ra>
